<compile_context>
chip_gen: v7x
topology: tpu7x:2x2x1
jax: 0.10.0
libtpu: 0.0.40
codegen_flags: <defaults>
</compile_context>

<pallas_src>
import functools

import jax
import jax.numpy as jnp
from jax import lax
from jax.experimental import pallas as pl
from jax.experimental.pallas import tpu as pltpu


K = 5           # effective kernel size after reparameterization
HALO = K // 2   # spatial halo = 2


def _round_up(x, m):
    return (x + m - 1) // m * m


# -----------------------------------------------------------------------------
# Pallas kernel: in-kernel im2col (25 shifted slices) + single GEMM + bias
# -----------------------------------------------------------------------------
def _mbr_im2col_gemm_kernel(w_ref, b_ref, x_ref, o_ref, p_ref, *, wp):
    # w_ref : (Cout, KC_PAD)      effective reparameterized weights
    # b_ref : (Cout, 1)           effective bias
    # x_ref : (1, Cin, S_IN)      halo-padded, flattened input row (one batch)
    # o_ref : (1, Cout, N_COLS)   output on the padded flat grid
    # p_ref : (KC_PAD, N_COLS)    f32 VMEM patch scratch
    cin = x_ref.shape[1]
    kc = K * K * cin
    kc_pad, n_cols = p_ref.shape

    # Zero the padded contraction rows (their weight columns are zero, but
    # uninitialized VMEM could hold NaNs and 0*NaN != 0).  56 rows = 7 sublanes.
    if kc_pad > kc:
        p_ref[kc:, :] = jnp.zeros((kc_pad - kc, n_cols), p_ref.dtype)

    # In-kernel im2col: tap (dy, dx) of output flat position g lives at flat
    # input position g + dy*Wp + dx, so each tap is one static shifted slice.
    for t in range(K * K):
        off = (t // K) * wp + (t % K)
        p_ref[t * cin:(t + 1) * cin, :] = (
            x_ref[0, :, off:off + n_cols].astype(p_ref.dtype))

    # Single GEMM (f32 accumulation) + bias.  MXU is structurally ~6% utilized
    # (Cout = 8); the kernel is memory-bound, so no further compute tuning.
    out = jnp.dot(w_ref[...].astype(jnp.float32), p_ref[...],
                  preferred_element_type=jnp.float32)
    o_ref[0] = (out + b_ref[...]).astype(o_ref.dtype)


# -----------------------------------------------------------------------------
# Forward pass (Pallas)
# -----------------------------------------------------------------------------
def mbr_conv5_forward(x_nchw, w_t_pad, b_col, *, compute_dtype=jnp.float32):
    b, cin, h, w = x_nchw.shape
    cout, kc_pad = w_t_pad.shape
    hp, wp = h + 2 * HALO, w + 2 * HALO
    s = hp * wp
    n_cols = _round_up(h * wp, 128)                            # lane-dense N
    s_in = _round_up(n_cols + (K - 1) * wp + (K - 1), 128)     # covers max tap

    # Halo pad + flatten (reshape is free); trailing zeros keep every in-kernel
    # tap slice in bounds.  No layout transpose of the activation anywhere.
    xf = jnp.pad(x_nchw, ((0, 0), (0, 0), (HALO, HALO), (HALO, HALO)))
    xf = xf.reshape(b, cin, s)
    xf = jnp.pad(xf, ((0, 0), (0, 0), (0, s_in - s))).astype(compute_dtype)
    w_in = w_t_pad.astype(compute_dtype)

    kernel = functools.partial(_mbr_im2col_gemm_kernel, wp=wp)
    out_flat = pl.pallas_call(
        kernel,
        out_shape=jax.ShapeDtypeStruct((b, cout, n_cols), jnp.float32),
        grid=(b,),
        in_specs=[
            pl.BlockSpec((cout, kc_pad), lambda i: (0, 0)),      # weights (resident)
            pl.BlockSpec((cout, 1), lambda i: (0, 0)),           # bias
            pl.BlockSpec((1, cin, s_in), lambda i: (i, 0, 0)),   # padded input row
        ],
        out_specs=pl.BlockSpec((1, cout, n_cols), lambda i: (i, 0, 0)),
        scratch_shapes=[pltpu.VMEM((kc_pad, n_cols), jnp.float32)],
        compiler_params=pltpu.CompilerParams(
            dimension_semantics=("parallel",)),   # 2 even steps -> v7x megacore
    )(w_in, b_col, xf)

    # Output columns live on the padded (H, Wp) grid; keep cols x < W.
    out = out_flat[:, :, :h * wp].reshape(b, cout, h, wp)[:, :, :, :w]
    return out


# -----------------------------------------------------------------------------
# Host-side reparameterization (mirror of MBRConv5.slim()), run once
# -----------------------------------------------------------------------------
def slim_params(p, eps=1e-5):
    cin, cout = p['cin'], p['cout']
    raw_w, raw_b, bn_w, bn_b = [], [], [], []
    for (w, b), (g, bt, mu, var) in zip(p['convs'], p['bns']):
        kh, kw = w.shape[2], w.shape[3]
        ph, pw = (K - kh) // 2, (K - kw) // 2
        wpad = jnp.pad(w, ((0, 0), (0, 0), (ph, ph), (pw, pw)))  # -> 5x5
        raw_w.append(wpad)
        raw_b.append(b)
        s = g / jnp.sqrt(var + eps)                              # BN fold
        bn_w.append(wpad * s[:, None, None, None])
        bn_b.append((b - mu) * s + bt)
    # concat order matches forward: [x1..x5, bn(x1)..bn(x5)]
    w_cat = jnp.concatenate(raw_w + bn_w, axis=0)    # (10*cmid, cin, 5, 5)
    b_cat = jnp.concatenate(raw_b + bn_b, axis=0)    # (10*cmid,)
    wc = p['wout'].reshape(cout, -1)                 # (cout, 10*cmid)
    w_slim = jnp.einsum('om,mikl->oikl', wc, w_cat)  # (cout, cin, 5, 5)
    b_slim = wc @ b_cat + p['bout']                  # (cout,)
    # row order (dy, dx, ci) must match the kernel's tap loop
    kc = K * K * cin
    kc_pad = _round_up(kc, 128)                      # 200 -> 256 (lane aligned)
    w_t = jnp.transpose(w_slim, (0, 2, 3, 1)).reshape(cout, kc)
    w_t = jnp.pad(w_t, ((0, 0), (0, kc_pad - kc)))
    return w_t, b_slim.reshape(cout, 1)


# -----------------------------------------------------------------------------
# Parameter init (deterministic, synthetic)
# -----------------------------------------------------------------------------
def _init_conv(key, cout, cin, kh, kw):
    k1, k2 = jax.random.split(key)
    w = jax.random.normal(k1, (cout, cin, kh, kw), jnp.float32) * 0.1
    b = jax.random.normal(k2, (cout,), jnp.float32) * 0.1
    return w, b


def _init_bn(key, c):
    k1, k2, k3, k4 = jax.random.split(key, 4)
    gamma = jax.random.uniform(k1, (c,), jnp.float32, 0.5, 1.5)
    beta = jax.random.normal(k2, (c,), jnp.float32) * 0.1
    mean = jax.random.normal(k3, (c,), jnp.float32) * 0.1
    var = jax.random.uniform(k4, (c,), jnp.float32, 0.5, 1.5)
    return gamma, beta, mean, var


def init_mbrconv5(key, cin, cout, rep_scale):
    cmid = cout * rep_scale
    # forward order: conv(5x5), conv1(1x1), conv2(3x3), crossh(3,1), crossv(1,3)
    ks = [(5, 5), (1, 1), (3, 3), (3, 1), (1, 3)]
    keys = jax.random.split(key, 2 * len(ks) + 1)
    convs = [_init_conv(keys[2 * i], cmid, cin, kh, kw)
             for i, (kh, kw) in enumerate(ks)]
    bns = [_init_bn(keys[2 * i + 1], cmid) for i in range(len(ks))]
    wout, bout = _init_conv(keys[-1], cout, 10 * cmid, 1, 1)
    return dict(convs=convs, bns=bns, wout=wout, bout=bout,
                cin=cin, cout=cout, cmid=cmid)


# -----------------------------------------------------------------------------
# Pure-JAX reference of the un-reparameterized forward (correctness check)
# -----------------------------------------------------------------------------
def _conv_ref(x_nhwc, w, bias):
    kh, kw = w.shape[2], w.shape[3]
    pad = [((kh - 1) // 2, (kh - 1) // 2), ((kw - 1) // 2, (kw - 1) // 2)]
    w_hwio = jnp.transpose(w, (2, 3, 1, 0))
    out = lax.conv_general_dilated(x_nhwc, w_hwio, (1, 1), pad,
                                   dimension_numbers=('NHWC', 'HWIO', 'NHWC'))
    return out + bias


def _bn_ref(y, bn, eps=1e-5):
    g, bt, mu, var = bn
    return (y - mu) / jnp.sqrt(var + eps) * g + bt


def mbr_conv5_ref(x_nchw, p):
    x = jnp.transpose(x_nchw, (0, 2, 3, 1))
    xs = [_conv_ref(x, w, b) for (w, b) in p['convs']]
    bns = [_bn_ref(y, bn) for y, bn in zip(xs, p['bns'])]
    cat = jnp.concatenate(xs + bns, axis=-1)
    out = _conv_ref(cat, p['wout'], p['bout'])
    return jnp.transpose(out, (0, 3, 1, 2))


# -----------------------------------------------------------------------------
if __name__ == "__main__":
    key = jax.random.PRNGKey(0)
    B, C_IN, C_OUT, H, W = 2, 8, 8, 16, 16
    REP_SCALE = 4

    kx, kp = jax.random.split(key)
    x = jax.random.normal(kx, (B, C_IN, H, W), jnp.float32)
    params = init_mbrconv5(kp, C_IN, C_OUT, REP_SCALE)

    # Reparameterize once (hoisted out of the forward pass).
    w_t_pad, b_col = slim_params(params)
    w_t_pad = jax.block_until_ready(w_t_pad)

    ref = mbr_conv5_ref(x, params)

    # f32 path: exact inference semantics of the module.
    fwd = jax.jit(mbr_conv5_forward)
    out = jax.block_until_ready(fwd(x, w_t_pad, b_col))
    assert out.shape == (B, C_OUT, H, W)
    err = float(jnp.max(jnp.abs(out - ref)))
    if not bool(jnp.allclose(out, ref, atol=3e-4, rtol=3e-4)):
        raise AssertionError(
            f"f32 Pallas output mismatch vs JAX reference, max|err|={err}")

    # bf16-operand path (halves HBM read bytes of x / weights; f32 accumulation).
    fwd_bf16 = jax.jit(functools.partial(mbr_conv5_forward,
                                         compute_dtype=jnp.bfloat16))
    out_bf16 = jax.block_until_ready(fwd_bf16(x, w_t_pad, b_col))
    err_bf16 = float(jnp.max(jnp.abs(out_bf16 - ref)))
    if err_bf16 > 0.25:
        raise AssertionError(
            f"bf16 Pallas output diverged from reference, max|err|={err_bf16}")

    print("KERNEL_OK")
</pallas_src>

<mosaic_0001>
module attributes {stable_mosaic.version = 11 : i64} {
  func.func @_mbr_im2col_gemm_kernel(%arg0: i32, %arg1: memref<8x256xf32, #tpu.memory_space<vmem>>, %arg2: memref<8x1xf32, #tpu.memory_space<vmem>>, %arg3: memref<1x8x512xf32, #tpu.memory_space<vmem>>, %arg4: memref<1x8x384xf32, #tpu.memory_space<vmem>>, %arg5: memref<256x384xf32, #tpu.memory_space<vmem>>) attributes {dimension_semantics = [#tpu.dimension_semantics<parallel>], iteration_bounds = array<i64: 2>, scalar_prefetch = 0 : i64, scratch_operands = 1 : i64, tpu.core_type = #tpu.core_type<tc>, window_params = [{pipeline_mode = #tpu.pipeline_mode<synchronous>, transform_indices = @transform_0, window_bounds = array<i64: 8, 256>}, {pipeline_mode = #tpu.pipeline_mode<synchronous>, transform_indices = @transform_1, window_bounds = array<i64: 8, 1>}, {transform_indices = @transform_2, window_bounds = array<i64: 1, 8, 512>}, {transform_indices = @transform_3, window_bounds = array<i64: 1, 8, 384>}]} {
    %cst = arith.constant 0.000000e+00 : f32
    %0 = vector.broadcast %cst : f32 to vector<56x384xf32>
    %c200 = arith.constant 200 : index
    %c0 = arith.constant 0 : index
    %1 = vector.load %arg5[%c200, %c0] : memref<256x384xf32, #tpu.memory_space<vmem>>, vector<56x384xf32>
    tpu.vector_store %arg5[%c200, %c0], %0 {strides = array<i32>} : memref<256x384xf32, #tpu.memory_space<vmem>>, vector<56x384xf32>,
    %c0_0 = arith.constant 0 : index
    %c0_1 = arith.constant 0 : index
    %c0_2 = arith.constant 0 : index
    %2 = vector.load %arg3[%c0_0, %c0_1, %c0_2] : memref<1x8x512xf32, #tpu.memory_space<vmem>>, vector<1x8x384xf32>
    %3 = vector.shape_cast %2 : vector<1x8x384xf32> to vector<8x384xf32>
    %c0_3 = arith.constant 0 : index
    %c0_4 = arith.constant 0 : index
    %4 = vector.load %arg5[%c0_3, %c0_4] : memref<256x384xf32, #tpu.memory_space<vmem>>, vector<8x384xf32>
    tpu.vector_store %arg5[%c0_3, %c0_4], %3 {strides = array<i32>} : memref<256x384xf32, #tpu.memory_space<vmem>>, vector<8x384xf32>,
    %c0_5 = arith.constant 0 : index
    %c0_6 = arith.constant 0 : index
    %c1 = arith.constant 1 : index
    %5 = vector.load %arg3[%c0_5, %c0_6, %c1] : memref<1x8x512xf32, #tpu.memory_space<vmem>>, vector<1x8x384xf32>
    %6 = vector.shape_cast %5 : vector<1x8x384xf32> to vector<8x384xf32>
    %c8 = arith.constant 8 : index
    %c0_7 = arith.constant 0 : index
    %7 = vector.load %arg5[%c8, %c0_7] : memref<256x384xf32, #tpu.memory_space<vmem>>, vector<8x384xf32>
    tpu.vector_store %arg5[%c8, %c0_7], %6 {strides = array<i32>} : memref<256x384xf32, #tpu.memory_space<vmem>>, vector<8x384xf32>,
    %c0_8 = arith.constant 0 : index
    %c0_9 = arith.constant 0 : index
    %c2 = arith.constant 2 : index
    %8 = vector.load %arg3[%c0_8, %c0_9, %c2] : memref<1x8x512xf32, #tpu.memory_space<vmem>>, vector<1x8x384xf32>
    %9 = vector.shape_cast %8 : vector<1x8x384xf32> to vector<8x384xf32>
    %c16 = arith.constant 16 : index
    %c0_10 = arith.constant 0 : index
    %10 = vector.load %arg5[%c16, %c0_10] : memref<256x384xf32, #tpu.memory_space<vmem>>, vector<8x384xf32>
    tpu.vector_store %arg5[%c16, %c0_10], %9 {strides = array<i32>} : memref<256x384xf32, #tpu.memory_space<vmem>>, vector<8x384xf32>,
    %c0_11 = arith.constant 0 : index
    %c0_12 = arith.constant 0 : index
    %c3 = arith.constant 3 : index
    %11 = vector.load %arg3[%c0_11, %c0_12, %c3] : memref<1x8x512xf32, #tpu.memory_space<vmem>>, vector<1x8x384xf32>
    %12 = vector.shape_cast %11 : vector<1x8x384xf32> to vector<8x384xf32>
    %c24 = arith.constant 24 : index
    %c0_13 = arith.constant 0 : index
    %13 = vector.load %arg5[%c24, %c0_13] : memref<256x384xf32, #tpu.memory_space<vmem>>, vector<8x384xf32>
    tpu.vector_store %arg5[%c24, %c0_13], %12 {strides = array<i32>} : memref<256x384xf32, #tpu.memory_space<vmem>>, vector<8x384xf32>,
    %c0_14 = arith.constant 0 : index
    %c0_15 = arith.constant 0 : index
    %c4 = arith.constant 4 : index
    %14 = vector.load %arg3[%c0_14, %c0_15, %c4] : memref<1x8x512xf32, #tpu.memory_space<vmem>>, vector<1x8x384xf32>
    %15 = vector.shape_cast %14 : vector<1x8x384xf32> to vector<8x384xf32>
    %c32 = arith.constant 32 : index
    %c0_16 = arith.constant 0 : index
    %16 = vector.load %arg5[%c32, %c0_16] : memref<256x384xf32, #tpu.memory_space<vmem>>, vector<8x384xf32>
    tpu.vector_store %arg5[%c32, %c0_16], %15 {strides = array<i32>} : memref<256x384xf32, #tpu.memory_space<vmem>>, vector<8x384xf32>,
    %c0_17 = arith.constant 0 : index
    %c0_18 = arith.constant 0 : index
    %c20 = arith.constant 20 : index
    %17 = vector.load %arg3[%c0_17, %c0_18, %c20] : memref<1x8x512xf32, #tpu.memory_space<vmem>>, vector<1x8x384xf32>
    %18 = vector.shape_cast %17 : vector<1x8x384xf32> to vector<8x384xf32>
    %c40 = arith.constant 40 : index
    %c0_19 = arith.constant 0 : index
    %19 = vector.load %arg5[%c40, %c0_19] : memref<256x384xf32, #tpu.memory_space<vmem>>, vector<8x384xf32>
    tpu.vector_store %arg5[%c40, %c0_19], %18 {strides = array<i32>} : memref<256x384xf32, #tpu.memory_space<vmem>>, vector<8x384xf32>,
    %c0_20 = arith.constant 0 : index
    %c0_21 = arith.constant 0 : index
    %c21 = arith.constant 21 : index
    %20 = vector.load %arg3[%c0_20, %c0_21, %c21] : memref<1x8x512xf32, #tpu.memory_space<vmem>>, vector<1x8x384xf32>
    %21 = vector.shape_cast %20 : vector<1x8x384xf32> to vector<8x384xf32>
    %c48 = arith.constant 48 : index
    %c0_22 = arith.constant 0 : index
    %22 = vector.load %arg5[%c48, %c0_22] : memref<256x384xf32, #tpu.memory_space<vmem>>, vector<8x384xf32>
    tpu.vector_store %arg5[%c48, %c0_22], %21 {strides = array<i32>} : memref<256x384xf32, #tpu.memory_space<vmem>>, vector<8x384xf32>,
    %c0_23 = arith.constant 0 : index
    %c0_24 = arith.constant 0 : index
    %c22 = arith.constant 22 : index
    %23 = vector.load %arg3[%c0_23, %c0_24, %c22] : memref<1x8x512xf32, #tpu.memory_space<vmem>>, vector<1x8x384xf32>
    %24 = vector.shape_cast %23 : vector<1x8x384xf32> to vector<8x384xf32>
    %c56 = arith.constant 56 : index
    %c0_25 = arith.constant 0 : index
    %25 = vector.load %arg5[%c56, %c0_25] : memref<256x384xf32, #tpu.memory_space<vmem>>, vector<8x384xf32>
    tpu.vector_store %arg5[%c56, %c0_25], %24 {strides = array<i32>} : memref<256x384xf32, #tpu.memory_space<vmem>>, vector<8x384xf32>,
    %c0_26 = arith.constant 0 : index
    %c0_27 = arith.constant 0 : index
    %c23 = arith.constant 23 : index
    %26 = vector.load %arg3[%c0_26, %c0_27, %c23] : memref<1x8x512xf32, #tpu.memory_space<vmem>>, vector<1x8x384xf32>
    %27 = vector.shape_cast %26 : vector<1x8x384xf32> to vector<8x384xf32>
    %c64 = arith.constant 64 : index
    %c0_28 = arith.constant 0 : index
    %28 = vector.load %arg5[%c64, %c0_28] : memref<256x384xf32, #tpu.memory_space<vmem>>, vector<8x384xf32>
    tpu.vector_store %arg5[%c64, %c0_28], %27 {strides = array<i32>} : memref<256x384xf32, #tpu.memory_space<vmem>>, vector<8x384xf32>,
    %c0_29 = arith.constant 0 : index
    %c0_30 = arith.constant 0 : index
    %c24_31 = arith.constant 24 : index
    %29 = vector.load %arg3[%c0_29, %c0_30, %c24_31] : memref<1x8x512xf32, #tpu.memory_space<vmem>>, vector<1x8x384xf32>
    %30 = vector.shape_cast %29 : vector<1x8x384xf32> to vector<8x384xf32>
    %c72 = arith.constant 72 : index
    %c0_32 = arith.constant 0 : index
    %31 = vector.load %arg5[%c72, %c0_32] : memref<256x384xf32, #tpu.memory_space<vmem>>, vector<8x384xf32>
    tpu.vector_store %arg5[%c72, %c0_32], %30 {strides = array<i32>} : memref<256x384xf32, #tpu.memory_space<vmem>>, vector<8x384xf32>,
    %c0_33 = arith.constant 0 : index
    %c0_34 = arith.constant 0 : index
    %c40_35 = arith.constant 40 : index
    %32 = vector.load %arg3[%c0_33, %c0_34, %c40_35] : memref<1x8x512xf32, #tpu.memory_space<vmem>>, vector<1x8x384xf32>
    %33 = vector.shape_cast %32 : vector<1x8x384xf32> to vector<8x384xf32>
    %c80 = arith.constant 80 : index
    %c0_36 = arith.constant 0 : index
    %34 = vector.load %arg5[%c80, %c0_36] : memref<256x384xf32, #tpu.memory_space<vmem>>, vector<8x384xf32>
    tpu.vector_store %arg5[%c80, %c0_36], %33 {strides = array<i32>} : memref<256x384xf32, #tpu.memory_space<vmem>>, vector<8x384xf32>,
    %c0_37 = arith.constant 0 : index
    %c0_38 = arith.constant 0 : index
    %c41 = arith.constant 41 : index
    %35 = vector.load %arg3[%c0_37, %c0_38, %c41] : memref<1x8x512xf32, #tpu.memory_space<vmem>>, vector<1x8x384xf32>
    %36 = vector.shape_cast %35 : vector<1x8x384xf32> to vector<8x384xf32>
    %c88 = arith.constant 88 : index
    %c0_39 = arith.constant 0 : index
    %37 = vector.load %arg5[%c88, %c0_39] : memref<256x384xf32, #tpu.memory_space<vmem>>, vector<8x384xf32>
    tpu.vector_store %arg5[%c88, %c0_39], %36 {strides = array<i32>} : memref<256x384xf32, #tpu.memory_space<vmem>>, vector<8x384xf32>,
    %c0_40 = arith.constant 0 : index
    %c0_41 = arith.constant 0 : index
    %c42 = arith.constant 42 : index
    %38 = vector.load %arg3[%c0_40, %c0_41, %c42] : memref<1x8x512xf32, #tpu.memory_space<vmem>>, vector<1x8x384xf32>
    %39 = vector.shape_cast %38 : vector<1x8x384xf32> to vector<8x384xf32>
    %c96 = arith.constant 96 : index
    %c0_42 = arith.constant 0 : index
    %40 = vector.load %arg5[%c96, %c0_42] : memref<256x384xf32, #tpu.memory_space<vmem>>, vector<8x384xf32>
    tpu.vector_store %arg5[%c96, %c0_42], %39 {strides = array<i32>} : memref<256x384xf32, #tpu.memory_space<vmem>>, vector<8x384xf32>,
    %c0_43 = arith.constant 0 : index
    %c0_44 = arith.constant 0 : index
    %c43 = arith.constant 43 : index
    %41 = vector.load %arg3[%c0_43, %c0_44, %c43] : memref<1x8x512xf32, #tpu.memory_space<vmem>>, vector<1x8x384xf32>
    %42 = vector.shape_cast %41 : vector<1x8x384xf32> to vector<8x384xf32>
    %c104 = arith.constant 104 : index
    %c0_45 = arith.constant 0 : index
    %43 = vector.load %arg5[%c104, %c0_45] : memref<256x384xf32, #tpu.memory_space<vmem>>, vector<8x384xf32>
    tpu.vector_store %arg5[%c104, %c0_45], %42 {strides = array<i32>} : memref<256x384xf32, #tpu.memory_space<vmem>>, vector<8x384xf32>,
    %c0_46 = arith.constant 0 : index
    %c0_47 = arith.constant 0 : index
    %c44 = arith.constant 44 : index
    %44 = vector.load %arg3[%c0_46, %c0_47, %c44] : memref<1x8x512xf32, #tpu.memory_space<vmem>>, vector<1x8x384xf32>
    %45 = vector.shape_cast %44 : vector<1x8x384xf32> to vector<8x384xf32>
    %c112 = arith.constant 112 : index
    %c0_48 = arith.constant 0 : index
    %46 = vector.load %arg5[%c112, %c0_48] : memref<256x384xf32, #tpu.memory_space<vmem>>, vector<8x384xf32>
    tpu.vector_store %arg5[%c112, %c0_48], %45 {strides = array<i32>} : memref<256x384xf32, #tpu.memory_space<vmem>>, vector<8x384xf32>,
    %c0_49 = arith.constant 0 : index
    %c0_50 = arith.constant 0 : index
    %c60 = arith.constant 60 : index
    %47 = vector.load %arg3[%c0_49, %c0_50, %c60] : memref<1x8x512xf32, #tpu.memory_space<vmem>>, vector<1x8x384xf32>
    %48 = vector.shape_cast %47 : vector<1x8x384xf32> to vector<8x384xf32>
    %c120 = arith.constant 120 : index
    %c0_51 = arith.constant 0 : index
    %49 = vector.load %arg5[%c120, %c0_51] : memref<256x384xf32, #tpu.memory_space<vmem>>, vector<8x384xf32>
    tpu.vector_store %arg5[%c120, %c0_51], %48 {strides = array<i32>} : memref<256x384xf32, #tpu.memory_space<vmem>>, vector<8x384xf32>,
    %c0_52 = arith.constant 0 : index
    %c0_53 = arith.constant 0 : index
    %c61 = arith.constant 61 : index
    %50 = vector.load %arg3[%c0_52, %c0_53, %c61] : memref<1x8x512xf32, #tpu.memory_space<vmem>>, vector<1x8x384xf32>
    %51 = vector.shape_cast %50 : vector<1x8x384xf32> to vector<8x384xf32>
    %c128 = arith.constant 128 : index
    %c0_54 = arith.constant 0 : index
    %52 = vector.load %arg5[%c128, %c0_54] : memref<256x384xf32, #tpu.memory_space<vmem>>, vector<8x384xf32>
    tpu.vector_store %arg5[%c128, %c0_54], %51 {strides = array<i32>} : memref<256x384xf32, #tpu.memory_space<vmem>>, vector<8x384xf32>,
    %c0_55 = arith.constant 0 : index
    %c0_56 = arith.constant 0 : index
    %c62 = arith.constant 62 : index
    %53 = vector.load %arg3[%c0_55, %c0_56, %c62] : memref<1x8x512xf32, #tpu.memory_space<vmem>>, vector<1x8x384xf32>
    %54 = vector.shape_cast %53 : vector<1x8x384xf32> to vector<8x384xf32>
    %c136 = arith.constant 136 : index
    %c0_57 = arith.constant 0 : index
    %55 = vector.load %arg5[%c136, %c0_57] : memref<256x384xf32, #tpu.memory_space<vmem>>, vector<8x384xf32>
    tpu.vector_store %arg5[%c136, %c0_57], %54 {strides = array<i32>} : memref<256x384xf32, #tpu.memory_space<vmem>>, vector<8x384xf32>,
    %c0_58 = arith.constant 0 : index
    %c0_59 = arith.constant 0 : index
    %c63 = arith.constant 63 : index
    %56 = vector.load %arg3[%c0_58, %c0_59, %c63] : memref<1x8x512xf32, #tpu.memory_space<vmem>>, vector<1x8x384xf32>
    %57 = vector.shape_cast %56 : vector<1x8x384xf32> to vector<8x384xf32>
    %c144 = arith.constant 144 : index
    %c0_60 = arith.constant 0 : index
    %58 = vector.load %arg5[%c144, %c0_60] : memref<256x384xf32, #tpu.memory_space<vmem>>, vector<8x384xf32>
    tpu.vector_store %arg5[%c144, %c0_60], %57 {strides = array<i32>} : memref<256x384xf32, #tpu.memory_space<vmem>>, vector<8x384xf32>,
    %c0_61 = arith.constant 0 : index
    %c0_62 = arith.constant 0 : index
    %c64_63 = arith.constant 64 : index
    %59 = vector.load %arg3[%c0_61, %c0_62, %c64_63] : memref<1x8x512xf32, #tpu.memory_space<vmem>>, vector<1x8x384xf32>
    %60 = vector.shape_cast %59 : vector<1x8x384xf32> to vector<8x384xf32>
    %c152 = arith.constant 152 : index
    %c0_64 = arith.constant 0 : index
    %61 = vector.load %arg5[%c152, %c0_64] : memref<256x384xf32, #tpu.memory_space<vmem>>, vector<8x384xf32>
    tpu.vector_store %arg5[%c152, %c0_64], %60 {strides = array<i32>} : memref<256x384xf32, #tpu.memory_space<vmem>>, vector<8x384xf32>,
    %c0_65 = arith.constant 0 : index
    %c0_66 = arith.constant 0 : index
    %c80_67 = arith.constant 80 : index
    %62 = vector.load %arg3[%c0_65, %c0_66, %c80_67] : memref<1x8x512xf32, #tpu.memory_space<vmem>>, vector<1x8x384xf32>
    %63 = vector.shape_cast %62 : vector<1x8x384xf32> to vector<8x384xf32>
    %c160 = arith.constant 160 : index
    %c0_68 = arith.constant 0 : index
    %64 = vector.load %arg5[%c160, %c0_68] : memref<256x384xf32, #tpu.memory_space<vmem>>, vector<8x384xf32>
    tpu.vector_store %arg5[%c160, %c0_68], %63 {strides = array<i32>} : memref<256x384xf32, #tpu.memory_space<vmem>>, vector<8x384xf32>,
    %c0_69 = arith.constant 0 : index
    %c0_70 = arith.constant 0 : index
    %c81 = arith.constant 81 : index
    %65 = vector.load %arg3[%c0_69, %c0_70, %c81] : memref<1x8x512xf32, #tpu.memory_space<vmem>>, vector<1x8x384xf32>
    %66 = vector.shape_cast %65 : vector<1x8x384xf32> to vector<8x384xf32>
    %c168 = arith.constant 168 : index
    %c0_71 = arith.constant 0 : index
    %67 = vector.load %arg5[%c168, %c0_71] : memref<256x384xf32, #tpu.memory_space<vmem>>, vector<8x384xf32>
    tpu.vector_store %arg5[%c168, %c0_71], %66 {strides = array<i32>} : memref<256x384xf32, #tpu.memory_space<vmem>>, vector<8x384xf32>,
    %c0_72 = arith.constant 0 : index
    %c0_73 = arith.constant 0 : index
    %c82 = arith.constant 82 : index
    %68 = vector.load %arg3[%c0_72, %c0_73, %c82] : memref<1x8x512xf32, #tpu.memory_space<vmem>>, vector<1x8x384xf32>
    %69 = vector.shape_cast %68 : vector<1x8x384xf32> to vector<8x384xf32>
    %c176 = arith.constant 176 : index
    %c0_74 = arith.constant 0 : index
    %70 = vector.load %arg5[%c176, %c0_74] : memref<256x384xf32, #tpu.memory_space<vmem>>, vector<8x384xf32>
    tpu.vector_store %arg5[%c176, %c0_74], %69 {strides = array<i32>} : memref<256x384xf32, #tpu.memory_space<vmem>>, vector<8x384xf32>,
    %c0_75 = arith.constant 0 : index
    %c0_76 = arith.constant 0 : index
    %c83 = arith.constant 83 : index
    %71 = vector.load %arg3[%c0_75, %c0_76, %c83] : memref<1x8x512xf32, #tpu.memory_space<vmem>>, vector<1x8x384xf32>
    %72 = vector.shape_cast %71 : vector<1x8x384xf32> to vector<8x384xf32>
    %c184 = arith.constant 184 : index
    %c0_77 = arith.constant 0 : index
    %73 = vector.load %arg5[%c184, %c0_77] : memref<256x384xf32, #tpu.memory_space<vmem>>, vector<8x384xf32>
    tpu.vector_store %arg5[%c184, %c0_77], %72 {strides = array<i32>} : memref<256x384xf32, #tpu.memory_space<vmem>>, vector<8x384xf32>,
    %c0_78 = arith.constant 0 : index
    %c0_79 = arith.constant 0 : index
    %c84 = arith.constant 84 : index
    %74 = vector.load %arg3[%c0_78, %c0_79, %c84] : memref<1x8x512xf32, #tpu.memory_space<vmem>>, vector<1x8x384xf32>
    %75 = vector.shape_cast %74 : vector<1x8x384xf32> to vector<8x384xf32>
    %c192 = arith.constant 192 : index
    %c0_80 = arith.constant 0 : index
    %76 = vector.load %arg5[%c192, %c0_80] : memref<256x384xf32, #tpu.memory_space<vmem>>, vector<8x384xf32>
    tpu.vector_store %arg5[%c192, %c0_80], %75 {strides = array<i32>} : memref<256x384xf32, #tpu.memory_space<vmem>>, vector<8x384xf32>,
    %c0_81 = arith.constant 0 : index
    %c0_82 = arith.constant 0 : index
    %77 = vector.load %arg1[%c0_81, %c0_82] : memref<8x256xf32, #tpu.memory_space<vmem>>, vector<8x256xf32>
    %c0_83 = arith.constant 0 : index
    %c0_84 = arith.constant 0 : index
    %78 = vector.load %arg5[%c0_83, %c0_84] : memref<256x384xf32, #tpu.memory_space<vmem>>, vector<256x384xf32>
    %cst_85 = arith.constant dense<0.000000e+00> : vector<8x384xf32>
    %79 = tpu.matmul %77, %78, %cst_85 {dimension_numbers = #tpu.dot_dimension_numbers<[1], [0], [0], [1], [0, 0, 1, 1], [], []>} : vector<8x256xf32>, vector<256x384xf32>, vector<8x384xf32> -> vector<8x384xf32>
    %c0_86 = arith.constant 0 : index
    %c0_87 = arith.constant 0 : index
    %80 = vector.load %arg2[%c0_86, %c0_87] : memref<8x1xf32, #tpu.memory_space<vmem>>, vector<8x1xf32>
    %81 = vector.broadcast %80 : vector<8x1xf32> to vector<8x384xf32>
    %82 = arith.addf %79, %81 : vector<8x384xf32>
    %c0_88 = arith.constant 0 : index
    %c0_89 = arith.constant 0 : index
    %c0_90 = arith.constant 0 : index
    %83 = vector.load %arg4[%c0_88, %c0_89, %c0_90] : memref<1x8x384xf32, #tpu.memory_space<vmem>>, vector<1x8x384xf32>
    %84 = vector.shape_cast %83 : vector<1x8x384xf32> to vector<8x384xf32>
    %85 = vector.shape_cast %82 : vector<8x384xf32> to vector<1x8x384xf32>
    tpu.vector_store %arg4[%c0_88, %c0_89, %c0_90], %85 {strides = array<i32>} : memref<1x8x384xf32, #tpu.memory_space<vmem>>, vector<1x8x384xf32>,
    return
  }
  func.func @transform_0(%arg0: i32) -> (i32, i32) {
    %c0_i32 = arith.constant 0 : i32
    %c0_i32_0 = arith.constant 0 : i32
    %c0_i32_1 = arith.constant 0 : i32
    return %c0_i32, %c0_i32_0 : i32, i32
  }
  func.func @transform_1(%arg0: i32) -> (i32, i32) {
    %c0_i32 = arith.constant 0 : i32
    %c0_i32_0 = arith.constant 0 : i32
    %c0_i32_1 = arith.constant 0 : i32
    return %c0_i32, %c0_i32_0 : i32, i32
  }
  func.func @transform_2(%arg0: i32) -> (i32, i32, i32) {
    %c0_i32 = arith.constant 0 : i32
    %c0_i32_0 = arith.constant 0 : i32
    %c0_i32_1 = arith.constant 0 : i32
    return %arg0, %c0_i32, %c0_i32_0 : i32, i32, i32
  }
  func.func @transform_3(%arg0: i32) -> (i32, i32, i32) {
    %c0_i32 = arith.constant 0 : i32
    %c0_i32_0 = arith.constant 0 : i32
    %c0_i32_1 = arith.constant 0 : i32
    return %arg0, %c0_i32, %c0_i32_0 : i32, i32, i32
  }
}

</mosaic_0001>

<bundles_post_ra>
// kernel: mbr_conv5_forward.1
= control target key start
LH: loop header
LB: loop body
LE: loop exit
PB: predicated region body
PF: predicated region fallthrough
CT: control target
= control target key end

     0   :  { %s1542_s12 = smov 0   ;;  %s1725_s0 = inlined_call_operand.vmem [shape: f32[8,256], index: 0, kind: input, shape index: {}]   ;;  %s1726_s1 = inlined_call_operand.vmem [shape: f32[8,1], index: 1, kind: input, shape index: {}]   ;;  %s1727_s2 = inlined_call_operand.vmem [shape: f32[2,8,512], index: 2, kind: input, shape index: {}]   ;;  %s1728_s3 = inlined_call_operand.vmem [shape: f32[2,8,384], index: 3, kind: output, shape index: {}]  }
   0x1 LB: > { %s1125_s13 = sadd.s32 4294967295, %s1493_s12   ;;  %p1129_p0 = scmp.ge.s32.totalorder %s1493_s12, 1  ;;  %s1493_s12 = sphi %s1542_s12, %s13_s12  }
   0x2   : > { %p137_p1 = scmp.lt.s32.totalorder %s1493_s12, 3 }
   0x4   : > { %p138_p2 = pnand %p1129_p0, %p137_p1 }
   0x5   : > { %p161_p3 = scmp.lt.s32.totalorder (!%p138_p2), %s1125_s13, 1  ;;  %v1495_v0 = vmov (!%p138_p2), 0.0|0.0   ;;  %s1496_s18 = smov (!%p138_p2), 126   ;;  %v823_v7 = vld [vmem:[%s1725_s0 + $0x8] sm:$0xff] (!%p138_p2)  ;;  %v1519_v8 = vmov (!%p138_p2), 0   ;;  %v920_v9 = vld [vmem:[%s1726_s1] sm:$0xff] (!%p138_p2) }
   0x6   : > { %141 = sbr.rel (%p138_p2) target bundleno = 448 (0x1c0), region = 32  ;;  %1184 = vmatprep.subr.bf16.mxu1 (!%p138_p2), %v1495_v0  ;;  %s1497_s19 = smov (!%p138_p2), 127   ;;  %990 = vmatprep.mubr.f32.mxu0 (!%p138_p2), %v823_v7  ;;  %vm214_vm0 = vcmask (!%p138_p2), 1039360   ;;  %vm240_vm1 = vcmask (!%p138_p2), 1031168   ;;  %vm266_vm2 = vcmask (!%p138_p2), 1022976   ;;  %vm292_vm3 = vcmask (!%p138_p2), 1014784  }
   0x7   : > { %s1498_s20 = smov (!%p138_p2), 125   ;;  %s1499_s21 = smov (!%p138_p2), 108   ;;  %1061 = vmatprep.mubr.f32.mxu1 (!%p138_p2), %v823_v7  ;;  %1486 = vset.pattern.permute.xlu0 (!%p138_p2), %v1519_v8  ;;  %vm318_vm4 = vcmask (!%p138_p2), 883712   ;;  %vm344_vm5 = vcmask (!%p138_p2), 875520   ;;  %vm370_vm6 = vcmask (!%p138_p2), 867328   ;;  %vm396_vm7 = vcmask (!%p138_p2), 859136  }
   0x8   : > { %s1500_s22 = smov (!%p138_p2), 124   ;;  %s1501_s23 = smov (!%p138_p2), 106   ;;  %vm422_vm8 = vcmask (!%p138_p2), 850944   ;;  %vm448_vm9 = vcmask (!%p138_p2), 719872   ;;  %vm474_vm10 = vcmask (!%p138_p2), 711680   ;;  %vm500_vm11 = vcmask (!%p138_p2), 703488  }
   0x9   : > { %s1502_s24 = smov (!%p138_p2), 107   ;;  %s1503_s25 = smov (!%p138_p2), 104   ;;  %vm526_vm12 = vcmask (!%p138_p2), 695296   ;;  %vm552_vm13 = vcmask (!%p138_p2), 687104   ;;  %vm578_vm14 = vcmask (!%p138_p2), 556032   ;;  %vm604_vm15 = vcmask (!%p138_p2), 547840  }
   0xa   : > { %s1504_s26 = smov (!%p138_p2), 105   ;;  %s1505_s27 = smov (!%p138_p2), 87  }
   0xb   : > { %s1506_s28 = smov (!%p138_p2), 88   ;;  %s1507_s29 = smov (!%p138_p2), 85  }
   0xc   : > { %s1508_s30 = smov (!%p138_p2), 86   ;;  %s1509_s4 = smov (!%p138_p2), 68  }
   0xd   : > { %s1730_s13 = smov (!%p161_p3, %s1125_s13), 1  ;;  %s1510_s5 = smov 84  }
   0xe   : > { %s1135_s14 = sshll.u32 %s1730_s13, 5  ;;  %s1511_s6 = smov 66  }
   0xf   : > { %s165_s17 = scalar_lea.vmem %s1727_s2, %s1135_s14  ;;  %s1512_s7 = smov 67  }
  0x10   : > { %v1557_v1 = vld [vmem:[%s165_s17 + $0x8] sm:$0xff]  ;;  %v1559_v2 = vld [vmem:[%s165_s17 + $0x10] sm:$0xff]  ;;  %v1561_v3 = vld [vmem:[%s165_s17] sm:$0xff]  ;;  %s1513_s8 = smov 64   ;;  %s1514_s9 = smov 65  }
  0x11   : > { %v1565_v4 = vpack.i.bf16 %v1559_v2, %v1557_v1  ;;  %v1567_v5 = vld [vmem:[%s165_s17 + $0x18] sm:$0xff]  ;;  %s1515_s10 = smov 47   ;;  %s1516_s11 = smov 48  }
  0x12   : > { %v1573_v6 = vpack.i.bf16 %v1567_v5, %v1561_v3  ;;  %s1517_s14 = smov 45   ;;  %s1518_s15 = smov 46  }
  0x13   : > { %1267 = vrot.lane.b32.xlu1 %v1565_v4, %s1496_s18  ;;  %1257 = vrot.lane.b32.xlu0 %v1565_v4, %s1497_s19 }
  0x17   : > { %1272 = vrot.lane.b32.xlu1 %v1565_v4, %s1498_s20  ;;  %1262 = vrot.lane.b32.xlu0 %v1573_v6, %s1497_s19 }
  0x1b   : > { %1282 = vrot.lane.b32.xlu1 %v1573_v6, %s1498_s20  ;;  %1277 = vrot.lane.b32.xlu0 %v1573_v6, %s1496_s18  ;;  %s1520_s18 = smov 44  }
  0x1f   : > { %1292 = vrot.lane.b32.xlu1 %v1565_v4, %s1499_s21  ;;  %1287 = vrot.lane.b32.xlu0 %v1565_v4, %s1500_s22 }
  0x23   : > { %1302 = vrot.lane.b32.xlu1 %v1573_v6, %s1499_s21  ;;  %1297 = vrot.lane.b32.xlu0 %v1573_v6, %s1500_s22 }
  0x27   : > { %1312 = vrot.lane.b32.xlu1 %v1565_v4, %s1501_s23  ;;  %1307 = vrot.lane.b32.xlu0 %v1565_v4, %s1502_s24 }
  0x2b   : > { %1322 = vrot.lane.b32.xlu1 %v1573_v6, %s1501_s23  ;;  %1317 = vrot.lane.b32.xlu0 %v1573_v6, %s1502_s24  ;;  %s1220_s23 = smul.u32 24, %s1730_s13 }
  0x2f   : > { %1332 = vrot.lane.b32.xlu1 %v1565_v4, %s1503_s25  ;;  %1327 = vrot.lane.b32.xlu0 %v1565_v4, %s1504_s26 }
  0x33   : > { %1342 = vrot.lane.b32.xlu1 %v1573_v6, %s1503_s25  ;;  %1337 = vrot.lane.b32.xlu0 %v1573_v6, %s1504_s26  ;;  %s170_s26 = scalar_lea.vmem %s1728_s3, %s1220_s23 }
  0x37   : > { %1352 = vrot.lane.b32.xlu1 %v1565_v4, %s1505_s27  ;;  %1347 = vrot.lane.b32.xlu0 %v1565_v4, %s1506_s28 }
  0x3b   : > { %1362 = vrot.lane.b32.xlu1 %v1573_v6, %s1505_s27  ;;  %1357 = vrot.lane.b32.xlu0 %v1573_v6, %s1506_s28 }
  0x3f   : > { %1372 = vrot.lane.b32.xlu1 %v1565_v4, %s1507_s29  ;;  %1367 = vrot.lane.b32.xlu0 %v1565_v4, %s1508_s30 }
  0x43   : > { %1382 = vrot.lane.b32.xlu1 %v1573_v6, %s1507_s29  ;;  %1377 = vrot.lane.b32.xlu0 %v1573_v6, %s1508_s30 }
  0x47   : > { %1392 = vrot.lane.b32.xlu1 %v1565_v4, %s1509_s4  ;;  %1387 = vrot.lane.b32.xlu0 %v1565_v4, %s1510_s5 }
  0x4b   : > { %1402 = vrot.lane.b32.xlu1 %v1573_v6, %s1509_s4  ;;  %1397 = vrot.lane.b32.xlu0 %v1573_v6, %s1510_s5 }
  0x4f   : > { %1412 = vrot.lane.b32.xlu1 %v1565_v4, %s1511_s6  ;;  %1407 = vrot.lane.b32.xlu0 %v1565_v4, %s1512_s7 }
  0x53   : > { %1422 = vrot.lane.b32.xlu1 %v1573_v6, %s1511_s6  ;;  %1417 = vrot.lane.b32.xlu0 %v1573_v6, %s1512_s7 }
  0x57   : > { %1432 = vrot.lane.b32.xlu1 %v1565_v4, %s1513_s8  ;;  %1427 = vrot.lane.b32.xlu0 %v1565_v4, %s1514_s9 }
  0x5b   : > { %1442 = vrot.lane.b32.xlu1 %v1573_v6, %s1513_s8  ;;  %1437 = vrot.lane.b32.xlu0 %v1573_v6, %s1514_s9 }
  0x5f   : > { %1452 = vrot.lane.b32.xlu1 %v1565_v4, %s1515_s10  ;;  %1447 = vrot.lane.b32.xlu0 %v1565_v4, %s1516_s11 }
  0x63   : > { %1462 = vrot.lane.b32.xlu1 %v1573_v6, %s1515_s10  ;;  %1457 = vrot.lane.b32.xlu0 %v1573_v6, %s1516_s11 }
  0x67   : > { %1472 = vrot.lane.b32.xlu1 %v1565_v4, %s1517_s14  ;;  %1467 = vrot.lane.b32.xlu0 %v1565_v4, %s1518_s15 }
  0x6b   : > { %1482 = vrot.lane.b32.xlu1 %v1573_v6, %s1517_s14  ;;  %1477 = vrot.lane.b32.xlu0 %v1573_v6, %s1518_s15 }
  0x6f   : > { %808 = vrot.lane.b32.xlu1 %v1559_v2, %s1520_s18  ;;  %806 = vrot.lane.b32.xlu0 %v1557_v1, %s1520_s18 }
  0x73   : > { %810 = vrot.lane.b32.xlu1 %v1567_v5, %s1520_s18  ;;  %804 = vrot.lane.b32.xlu0 %v1561_v3, %s1520_s18 }
  0x77   : > { %923 = vperm.xlu0 %1486, %v920_v9  }
  0x85   : > { %v1268_v10 = vpop.permute.xlu1 %1267  ;;  %v1258_v11 = vpop.permute.xlu0 %1257 }
  0x86   : > { %v1260_v12 = vunpack.i.h.bf16 %v1258_v11  ;;  %v1259_v13 = vunpack.i.l.bf16 %v1258_v11  ;;  %v1270_v14 = vunpack.i.h.bf16 %v1268_v10  ;;  %v1269_v15 = vunpack.i.l.bf16 %v1268_v10 }
  0x88   : > { %v216_v16 = vsel %vm214_vm0, %v1259_v13, %v1260_v12  ;;  %v242_v26 = vsel %vm240_vm1, %v1269_v15, %v1270_v14 }
  0x89   : > { %v1273_v17 = vpop.permute.xlu1 %1272  ;;  %v1263_v18 = vpop.permute.xlu0 %1262  ;;  %v1136_v19 = vpack.c.bf16 %v216_v16, %v1557_v1 }
  0x8a   : > { %v1275_v20 = vunpack.i.h.bf16 %v1273_v17  ;;  %v1274_v21 = vunpack.i.l.bf16 %v1273_v17  ;;  %v1265_v22 = vunpack.i.h.bf16 %v1263_v18  ;;  %v1264_v23 = vunpack.i.l.bf16 %v1263_v18 }
  0x8b   : > { %1137 = vmatprep.subr.bf16.mxu0 %v1136_v19 }
  0x8c   : > { %v215_v24 = vsel %vm214_vm0, %v1264_v23, %v1259_v13  ;;  %v217_v25 = vsel %vm214_vm0, %v1260_v12, %v1265_v22  ;;  %v268_v27 = vsel %vm266_vm2, %v1274_v21, %v1275_v20  ;;  %vm630_vm0 = vcmask 539648  }
  0x8d   : > { %v1283_v28 = vpop.permute.xlu1 %1282  ;;  %v1278_v29 = vpop.permute.xlu0 %1277  ;;  %v1138_v30 = vpack.c.bf16 %v215_v24, %v1561_v3  ;;  %v1185_v31 = vpack.c.bf16 %v217_v25, %v1559_v2  ;;  %v1140_v32 = vpack.c.bf16 %v268_v27, %v242_v26 }
  0x8e   : > { %v1285_v33 = vunpack.i.h.bf16 %v1283_v28  ;;  %v1284_v34 = vunpack.i.l.bf16 %v1283_v28  ;;  %v1280_v35 = vunpack.i.h.bf16 %v1278_v29  ;;  %v1279_v36 = vunpack.i.l.bf16 %v1278_v29 }
  0x8f   : > { %1139 = vmatpush1.bf16.msra.mxu0 %v1138_v30  ;;  %1186 = vmatpush1.bf16.msra.mxu1 %v1185_v31 }
  0x90   : > { %1141 = vmatprep.subr.bf16.mxu0 %v1140_v32  ;;  %1187 = vmatprep.subr.bf16.mxu1 %v1495_v0  ;;  %v241_v37 = vsel %vm240_vm1, %v1279_v36, %v1269_v15  ;;  %v267_v38 = vsel %vm266_vm2, %v1284_v34, %v1274_v21  ;;  %v243_v39 = vsel %vm240_vm1, %v1270_v14, %v1280_v35  ;;  %vm656_vm1 = vcmask 531456  }
  0x91   : > { %v1293_v40 = vpop.permute.xlu1 %1292  ;;  %v1288_v41 = vpop.permute.xlu0 %1287  ;;  %v1142_v42 = vpack.c.bf16 %v267_v38, %v241_v37  ;;  %v269_v43 = vsel %vm266_vm2, %v1275_v20, %v1285_v33  ;;  %vm682_vm2 = vcmask 523264  }
  0x92   : > { %v1295_v44 = vunpack.i.h.bf16 %v1293_v40  ;;  %v1294_v45 = vunpack.i.l.bf16 %v1293_v40  ;;  %v1290_v46 = vunpack.i.h.bf16 %v1288_v41  ;;  %v1289_v47 = vunpack.i.l.bf16 %v1288_v41 }
  0x93   : > { %1143 = vmatpush1.bf16.msra.mxu0 %v1142_v42  ;;  %v1188_v48 = vpack.c.bf16 %v269_v43, %v243_v39 }
  0x94   : > { %v294_v49 = vsel %vm292_vm3, %v1289_v47, %v1290_v46  ;;  %v320_v50 = vsel %vm318_vm4, %v1294_v45, %v1295_v44 }
  0x95   : > { %1189 = vmatpush1.bf16.msra.mxu1 %v1188_v48  ;;  %v1303_v51 = vpop.permute.xlu1 %1302  ;;  %v1298_v52 = vpop.permute.xlu0 %1297  ;;  %v1144_v53 = vpack.c.bf16 %v320_v50, %v294_v49 }
  0x96   : > { %v1305_v54 = vunpack.i.h.bf16 %v1303_v51  ;;  %v1304_v55 = vunpack.i.l.bf16 %v1303_v51  ;;  %v1300_v56 = vunpack.i.h.bf16 %v1298_v52  ;;  %v1299_v57 = vunpack.i.l.bf16 %v1298_v52  ;;  %1190 = vmatprep.subr.bf16.mxu1 %v1495_v0 }
  0x97   : > { %1145 = vmatprep.subr.bf16.mxu0 %v1144_v53 }
  0x98   : > { %v293_v58 = vsel %vm292_vm3, %v1299_v57, %v1289_v47  ;;  %v319_v59 = vsel %vm318_vm4, %v1304_v55, %v1294_v45  ;;  %v295_v60 = vsel %vm292_vm3, %v1290_v46, %v1300_v56  ;;  %v321_v61 = vsel %vm318_vm4, %v1295_v44, %v1305_v54 }
  0x99   : > { %v1313_v62 = vpop.permute.xlu1 %1312  ;;  %v1308_v63 = vpop.permute.xlu0 %1307  ;;  %v1146_v1 = vpack.c.bf16 %v319_v59, %v293_v58  ;;  %v1191_v2 = vpack.c.bf16 %v321_v61, %v295_v60  ;;  %vm708_vm3 = vcmask 392192   ;;  %vm734_vm4 = vcmask 384000  }
  0x9a   : > { %v1315_v3 = vunpack.i.h.bf16 %v1313_v62  ;;  %v1314_v4 = vunpack.i.l.bf16 %v1313_v62  ;;  %v1310_v5 = vunpack.i.h.bf16 %v1308_v63  ;;  %v1309_v6 = vunpack.i.l.bf16 %v1308_v63 }
  0x9b   : > { %1147 = vmatpush1.bf16.msra.mxu0 %v1146_v1  ;;  %1192 = vmatpush1.bf16.msra.mxu1 %v1191_v2 }
  0x9c   : > { %v346_v7 = vsel %vm344_vm5, %v1309_v6, %v1310_v5  ;;  %v372_v8 = vsel %vm370_vm6, %v1314_v4, %v1315_v3  ;;  %1193 = vmatprep.subr.bf16.mxu1 %v1495_v0 }
  0x9d   : > { %v1323_v9 = vpop.permute.xlu1 %1322  ;;  %v1318_v10 = vpop.permute.xlu0 %1317  ;;  %v1148_v11 = vpack.c.bf16 %v372_v8, %v346_v7 }
  0x9e   : > { %v1325_v12 = vunpack.i.h.bf16 %v1323_v9  ;;  %v1324_v13 = vunpack.i.l.bf16 %v1323_v9  ;;  %v1320_v14 = vunpack.i.h.bf16 %v1318_v10  ;;  %v1319_v15 = vunpack.i.l.bf16 %v1318_v10 }
  0x9f   : > { %1149 = vmatprep.subr.bf16.mxu0 %v1148_v11 }
  0xa0   : > { %v345_v16 = vsel %vm344_vm5, %v1319_v15, %v1309_v6  ;;  %v371_v17 = vsel %vm370_vm6, %v1324_v13, %v1314_v4  ;;  %v347_v18 = vsel %vm344_vm5, %v1310_v5, %v1320_v14  ;;  %v373_v19 = vsel %vm370_vm6, %v1315_v3, %v1325_v12 }
  0xa1   : > { %v1333_v20 = vpop.permute.xlu1 %1332  ;;  %v1328_v21 = vpop.permute.xlu0 %1327  ;;  %v1150_v22 = vpack.c.bf16 %v371_v17, %v345_v16  ;;  %v1194_v23 = vpack.c.bf16 %v373_v19, %v347_v18  ;;  %vm760_vm5 = vcmask 375808   ;;  %vm786_vm6 = vcmask 367616  }
  0xa2   : > { %v1335_v24 = vunpack.i.h.bf16 %v1333_v20  ;;  %v1334_v25 = vunpack.i.l.bf16 %v1333_v20  ;;  %v1330_v26 = vunpack.i.h.bf16 %v1328_v21  ;;  %v1329_v27 = vunpack.i.l.bf16 %v1328_v21 }
  0xa3   : > { %1151 = vmatpush1.bf16.msra.mxu0 %v1150_v22  ;;  %1195 = vmatpush1.bf16.msra.mxu1 %v1194_v23 }
  0xa4   : > { %v398_v28 = vsel %vm396_vm7, %v1329_v27, %v1330_v26  ;;  %v424_v29 = vsel %vm422_vm8, %v1334_v25, %v1335_v24  ;;  %1196 = vmatprep.subr.bf16.mxu1 %v1495_v0 }
  0xa5   : > { %v1343_v30 = vpop.permute.xlu1 %1342  ;;  %v1338_v31 = vpop.permute.xlu0 %1337  ;;  %v1152_v32 = vpack.c.bf16 %v424_v29, %v398_v28 }
  0xa6   : > { %v1345_v33 = vunpack.i.h.bf16 %v1343_v30  ;;  %v1344_v34 = vunpack.i.l.bf16 %v1343_v30  ;;  %v1340_v35 = vunpack.i.h.bf16 %v1338_v31  ;;  %v1339_v36 = vunpack.i.l.bf16 %v1338_v31 }
  0xa7   : > { %1153 = vmatprep.subr.bf16.mxu0 %v1152_v32 }
  0xa8   : > { %v397_v37 = vsel %vm396_vm7, %v1339_v36, %v1329_v27  ;;  %v423_v38 = vsel %vm422_vm8, %v1344_v34, %v1334_v25  ;;  %v399_v39 = vsel %vm396_vm7, %v1330_v26, %v1340_v35  ;;  %v425_v40 = vsel %vm422_vm8, %v1335_v24, %v1345_v33 }
  0xa9   : > { %v1353_v41 = vpop.permute.xlu1 %1352  ;;  %v1348_v42 = vpop.permute.xlu0 %1347  ;;  %v1154_v43 = vpack.c.bf16 %v423_v38, %v397_v37  ;;  %v1197_v44 = vpack.c.bf16 %v425_v40, %v399_v39  ;;  %vm812_vm7 = vcmask 359424  }
  0xaa   : > { %v1355_v45 = vunpack.i.h.bf16 %v1353_v41  ;;  %v1354_v46 = vunpack.i.l.bf16 %v1353_v41  ;;  %v1350_v47 = vunpack.i.h.bf16 %v1348_v42  ;;  %v1349_v48 = vunpack.i.l.bf16 %v1348_v42 }
  0xab   : > { %1155 = vmatpush1.bf16.msra.mxu0 %v1154_v43  ;;  %1198 = vmatpush1.bf16.msra.mxu1 %v1197_v44 }
  0xac   : > { %v450_v49 = vsel %vm448_vm9, %v1349_v48, %v1350_v47  ;;  %v476_v50 = vsel %vm474_vm10, %v1354_v46, %v1355_v45  ;;  %1199 = vmatprep.subr.bf16.mxu1 %v1495_v0 }
  0xad   : > { %v1363_v51 = vpop.permute.xlu1 %1362  ;;  %v1358_v52 = vpop.permute.xlu0 %1357  ;;  %v1156_v53 = vpack.c.bf16 %v476_v50, %v450_v49 }
  0xae   : > { %v1365_v54 = vunpack.i.h.bf16 %v1363_v51  ;;  %v1364_v55 = vunpack.i.l.bf16 %v1363_v51  ;;  %v1360_v56 = vunpack.i.h.bf16 %v1358_v52  ;;  %v1359_v57 = vunpack.i.l.bf16 %v1358_v52 }
  0xaf   : > { %1157 = vmatprep.subr.bf16.mxu0 %v1156_v53 }
  0xb0   : > { %v449_v58 = vsel %vm448_vm9, %v1359_v57, %v1349_v48  ;;  %v475_v59 = vsel %vm474_vm10, %v1364_v55, %v1354_v46  ;;  %v451_v60 = vsel %vm448_vm9, %v1350_v47, %v1360_v56  ;;  %v477_v61 = vsel %vm474_vm10, %v1355_v45, %v1365_v54 }
  0xb1   : > { %v1373_v62 = vpop.permute.xlu1 %1372  ;;  %v1368_v63 = vpop.permute.xlu0 %1367  ;;  %v1158_v1 = vpack.c.bf16 %v475_v59, %v449_v58  ;;  %v1200_v2 = vpack.c.bf16 %v477_v61, %v451_v60 }
  0xb2   : > { %v1375_v3 = vunpack.i.h.bf16 %v1373_v62  ;;  %v1374_v4 = vunpack.i.l.bf16 %v1373_v62  ;;  %v1370_v5 = vunpack.i.h.bf16 %v1368_v63  ;;  %v1369_v6 = vunpack.i.l.bf16 %v1368_v63 }
  0xb3   : > { %1159 = vmatpush1.bf16.msra.mxu0 %v1158_v1  ;;  %1201 = vmatpush1.bf16.msra.mxu1 %v1200_v2 }
  0xb4   : > { %v502_v7 = vsel %vm500_vm11, %v1369_v6, %v1370_v5  ;;  %v528_v8 = vsel %vm526_vm12, %v1374_v4, %v1375_v3  ;;  %1202 = vmatprep.subr.bf16.mxu1 %v1495_v0 }
  0xb5   : > { %v1383_v9 = vpop.permute.xlu1 %1382  ;;  %v1378_v10 = vpop.permute.xlu0 %1377  ;;  %v1160_v11 = vpack.c.bf16 %v528_v8, %v502_v7 }
  0xb6   : > { %v1385_v12 = vunpack.i.h.bf16 %v1383_v9  ;;  %v1384_v13 = vunpack.i.l.bf16 %v1383_v9  ;;  %v1380_v14 = vunpack.i.h.bf16 %v1378_v10  ;;  %v1379_v15 = vunpack.i.l.bf16 %v1378_v10 }
  0xb7   : > { %1161 = vmatprep.subr.bf16.mxu0 %v1160_v11 }
  0xb8   : > { %v501_v16 = vsel %vm500_vm11, %v1379_v15, %v1369_v6  ;;  %v527_v17 = vsel %vm526_vm12, %v1384_v13, %v1374_v4  ;;  %v503_v18 = vsel %vm500_vm11, %v1370_v5, %v1380_v14  ;;  %v529_v19 = vsel %vm526_vm12, %v1375_v3, %v1385_v12 }
  0xb9   : > { %v1393_v20 = vpop.permute.xlu1 %1392  ;;  %v1388_v21 = vpop.permute.xlu0 %1387  ;;  %v1162_v22 = vpack.c.bf16 %v527_v17, %v501_v16  ;;  %v1203_v23 = vpack.c.bf16 %v529_v19, %v503_v18 }
  0xba   : > { %v1395_v24 = vunpack.i.h.bf16 %v1393_v20  ;;  %v1394_v25 = vunpack.i.l.bf16 %v1393_v20  ;;  %v1390_v26 = vunpack.i.h.bf16 %v1388_v21  ;;  %v1389_v27 = vunpack.i.l.bf16 %v1388_v21 }
  0xbb   : > { %1163 = vmatpush1.bf16.msra.mxu0 %v1162_v22  ;;  %1204 = vmatpush1.bf16.msra.mxu1 %v1203_v23 }
  0xbc   : > { %v554_v28 = vsel %vm552_vm13, %v1389_v27, %v1390_v26  ;;  %v580_v29 = vsel %vm578_vm14, %v1394_v25, %v1395_v24  ;;  %1205 = vmatprep.subr.bf16.mxu1 %v1495_v0 }
  0xbd   : > { %v1403_v30 = vpop.permute.xlu1 %1402  ;;  %v1398_v31 = vpop.permute.xlu0 %1397  ;;  %v1164_v32 = vpack.c.bf16 %v580_v29, %v554_v28 }
  0xbe   : > { %v1405_v33 = vunpack.i.h.bf16 %v1403_v30  ;;  %v1404_v34 = vunpack.i.l.bf16 %v1403_v30  ;;  %v1400_v35 = vunpack.i.h.bf16 %v1398_v31  ;;  %v1399_v36 = vunpack.i.l.bf16 %v1398_v31 }
  0xbf   : > { %1165 = vmatprep.subr.bf16.mxu0 %v1164_v32 }
  0xc0   : > { %v553_v37 = vsel %vm552_vm13, %v1399_v36, %v1389_v27  ;;  %v579_v38 = vsel %vm578_vm14, %v1404_v34, %v1394_v25  ;;  %v555_v39 = vsel %vm552_vm13, %v1390_v26, %v1400_v35  ;;  %v581_v40 = vsel %vm578_vm14, %v1395_v24, %v1405_v33 }
  0xc1   : > { %v1413_v41 = vpop.permute.xlu1 %1412  ;;  %v1408_v42 = vpop.permute.xlu0 %1407  ;;  %v1166_v43 = vpack.c.bf16 %v579_v38, %v553_v37  ;;  %v1206_v44 = vpack.c.bf16 %v581_v40, %v555_v39 }
  0xc2   : > { %v1415_v45 = vunpack.i.h.bf16 %v1413_v41  ;;  %v1414_v46 = vunpack.i.l.bf16 %v1413_v41  ;;  %v1410_v47 = vunpack.i.h.bf16 %v1408_v42  ;;  %v1409_v48 = vunpack.i.l.bf16 %v1408_v42 }
  0xc3   : > { %1167 = vmatpush1.bf16.msra.mxu0 %v1166_v43  ;;  %1207 = vmatpush1.bf16.msra.mxu1 %v1206_v44 }
  0xc4   : > { %v606_v49 = vsel %vm604_vm15, %v1409_v48, %v1410_v47  ;;  %v632_v50 = vsel %vm630_vm0, %v1414_v46, %v1415_v45  ;;  %1208 = vmatprep.subr.bf16.mxu1 %v1495_v0 }
  0xc5   : > { %v1423_v51 = vpop.permute.xlu1 %1422  ;;  %v1418_v52 = vpop.permute.xlu0 %1417  ;;  %v1168_v53 = vpack.c.bf16 %v632_v50, %v606_v49 }
  0xc6   : > { %v1425_v54 = vunpack.i.h.bf16 %v1423_v51  ;;  %v1424_v55 = vunpack.i.l.bf16 %v1423_v51  ;;  %v1420_v56 = vunpack.i.h.bf16 %v1418_v52  ;;  %v1419_v57 = vunpack.i.l.bf16 %v1418_v52 }
  0xc7   : > { %1169 = vmatprep.subr.bf16.mxu0 %v1168_v53 }
  0xc8   : > { %v605_v58 = vsel %vm604_vm15, %v1419_v57, %v1409_v48  ;;  %v631_v59 = vsel %vm630_vm0, %v1424_v55, %v1414_v46  ;;  %v607_v60 = vsel %vm604_vm15, %v1410_v47, %v1420_v56  ;;  %v633_v61 = vsel %vm630_vm0, %v1415_v45, %v1425_v54 }
  0xc9   : > { %v1433_v62 = vpop.permute.xlu1 %1432  ;;  %v1428_v63 = vpop.permute.xlu0 %1427  ;;  %v1170_v1 = vpack.c.bf16 %v631_v59, %v605_v58  ;;  %v1209_v2 = vpack.c.bf16 %v633_v61, %v607_v60 }
  0xca   : > { %v1435_v3 = vunpack.i.h.bf16 %v1433_v62  ;;  %v1434_v4 = vunpack.i.l.bf16 %v1433_v62  ;;  %v1430_v5 = vunpack.i.h.bf16 %v1428_v63  ;;  %v1429_v6 = vunpack.i.l.bf16 %v1428_v63 }
  0xcb   : > { %1171 = vmatpush1.bf16.msra.mxu0 %v1170_v1  ;;  %1210 = vmatpush1.bf16.msra.mxu1 %v1209_v2 }
  0xcc   : > { %v658_v7 = vsel %vm656_vm1, %v1429_v6, %v1430_v5  ;;  %v684_v8 = vsel %vm682_vm2, %v1434_v4, %v1435_v3  ;;  %1211 = vmatprep.subr.bf16.mxu1 %v1495_v0 }
  0xcd   : > { %v1443_v9 = vpop.permute.xlu1 %1442  ;;  %v1438_v10 = vpop.permute.xlu0 %1437  ;;  %v1172_v11 = vpack.c.bf16 %v684_v8, %v658_v7 }
  0xce   : > { %v1445_v12 = vunpack.i.h.bf16 %v1443_v9  ;;  %v1444_v13 = vunpack.i.l.bf16 %v1443_v9  ;;  %v1440_v14 = vunpack.i.h.bf16 %v1438_v10  ;;  %v1439_v15 = vunpack.i.l.bf16 %v1438_v10 }
  0xcf   : > { %1173 = vmatprep.subr.bf16.mxu0 %v1172_v11 }
  0xd0   : > { %v657_v16 = vsel %vm656_vm1, %v1439_v15, %v1429_v6  ;;  %v683_v17 = vsel %vm682_vm2, %v1444_v13, %v1434_v4  ;;  %v659_v18 = vsel %vm656_vm1, %v1430_v5, %v1440_v14  ;;  %v685_v19 = vsel %vm682_vm2, %v1435_v3, %v1445_v12  ;;  %v822_v6 = vld [vmem:[%s1725_s0] sm:$0xff] }
  0xd1   : > { %v1453_v20 = vpop.permute.xlu1 %1452  ;;  %v1448_v21 = vpop.permute.xlu0 %1447  ;;  %v1174_v22 = vpack.c.bf16 %v683_v17, %v657_v16  ;;  %v1212_v23 = vpack.c.bf16 %v685_v19, %v659_v18  ;;  %v1521_v3 = vmov 0.0  }
  0xd2   : > { %v1455_v24 = vunpack.i.h.bf16 %v1453_v20  ;;  %v1454_v25 = vunpack.i.l.bf16 %v1453_v20  ;;  %v1450_v26 = vunpack.i.h.bf16 %v1448_v21  ;;  %v1449_v27 = vunpack.i.l.bf16 %v1448_v21 }
  0xd3   : > { %1175 = vmatpush1.bf16.msra.mxu0 %v1174_v22  ;;  %1213 = vmatpush1.bf16.msra.mxu1 %v1212_v23 }
  0xd4   : > { %v710_v28 = vsel %vm708_vm3, %v1449_v27, %v1450_v26  ;;  %v736_v29 = vsel %vm734_vm4, %v1454_v25, %v1455_v24  ;;  %1214 = vmatprep.subr.bf16.mxu1 %v1495_v0 }
  0xd5   : > { %v1463_v30 = vpop.permute.xlu1 %1462  ;;  %v1458_v31 = vpop.permute.xlu0 %1457  ;;  %v1176_v32 = vpack.c.bf16 %v736_v29, %v710_v28 }
  0xd6   : > { %v1465_v33 = vunpack.i.h.bf16 %v1463_v30  ;;  %v1464_v34 = vunpack.i.l.bf16 %v1463_v30  ;;  %v1460_v35 = vunpack.i.h.bf16 %v1458_v31  ;;  %v1459_v36 = vunpack.i.l.bf16 %v1458_v31 }
  0xd7   : > { %1177 = vmatprep.subr.bf16.mxu0 %v1176_v32 }
  0xd8   : > { %v709_v37 = vsel %vm708_vm3, %v1459_v36, %v1449_v27  ;;  %v735_v38 = vsel %vm734_vm4, %v1464_v34, %v1454_v25  ;;  %v711_v39 = vsel %vm708_vm3, %v1450_v26, %v1460_v35  ;;  %v737_v40 = vsel %vm734_vm4, %v1455_v24, %v1465_v33 }
  0xd9   : > { %v1473_v41 = vpop.permute.xlu1 %1472  ;;  %v1468_v42 = vpop.permute.xlu0 %1467  ;;  %v1178_v43 = vpack.c.bf16 %v735_v38, %v709_v37  ;;  %v1215_v44 = vpack.c.bf16 %v737_v40, %v711_v39 }
  0xda   : > { %v1475_v45 = vunpack.i.h.bf16 %v1473_v41  ;;  %v1474_v46 = vunpack.i.l.bf16 %v1473_v41  ;;  %v1470_v47 = vunpack.i.h.bf16 %v1468_v42  ;;  %v1469_v48 = vunpack.i.l.bf16 %v1468_v42 }
  0xdb   : > { %1179 = vmatpush1.bf16.msra.mxu0 %v1178_v43  ;;  %1216 = vmatpush1.bf16.msra.mxu1 %v1215_v44 }
  0xdc   : > { %v762_v49 = vsel %vm760_vm5, %v1469_v48, %v1470_v47  ;;  %v788_v50 = vsel %vm786_vm6, %v1474_v46, %v1475_v45  ;;  %1217 = vmatprep.subr.bf16.mxu1 %v1495_v0 }
  0xdd   : > { %v1483_v51 = vpop.permute.xlu1 %1482  ;;  %v1478_v52 = vpop.permute.xlu0 %1477  ;;  %v1180_v53 = vpack.c.bf16 %v788_v50, %v762_v49 }
  0xde   : > { %v1485_v54 = vunpack.i.h.bf16 %v1483_v51  ;;  %v1484_v55 = vunpack.i.l.bf16 %v1483_v51  ;;  %v1480_v56 = vunpack.i.h.bf16 %v1478_v52  ;;  %v1479_v57 = vunpack.i.l.bf16 %v1478_v52 }
  0xdf   : > { %1181 = vmatprep.subr.bf16.mxu0 %v1180_v53 }
  0xe0   : > { %v761_v58 = vsel %vm760_vm5, %v1479_v57, %v1469_v48  ;;  %v787_v59 = vsel %vm786_vm6, %v1484_v55, %v1474_v46  ;;  %v763_v60 = vsel %vm760_vm5, %v1470_v47, %v1480_v56  ;;  %v789_v61 = vsel %vm786_vm6, %v1475_v45, %v1485_v54 }
  0xe1   : > { %v809_v62 = vpop.permute.xlu1 %808  ;;  %v807_v63 = vpop.permute.xlu0 %806  ;;  %v1182_v0 = vpack.c.bf16 %v787_v59, %v761_v58  ;;  %v1218_v1 = vpack.c.bf16 %v789_v61, %v763_v60 }
  0xe2   : > { %v814_v2 = vsel %vm812_vm7, %v807_v63, %v809_v62 }
  0xe3   : > { %1183 = vmatpush1.bf16.msra.mxu0 %v1182_v0  ;;  %1219 = vmatpush1.bf16.msra.mxu1 %v1218_v1 }
  0xe4   : > { %974 = vmatprep.subr.mxu0 %v814_v2  ;;  %1045 = vmatprep.subr.mxu1 %v1521_v3 }
  0xe5   : > { %v811_v4 = vpop.permute.xlu1 %810  ;;  %v805_v5 = vpop.permute.xlu0 %804 }
  0xe6   : > { %v813_v7 = vsel %vm812_vm7, %v805_v5, %v807_v63  ;;  %v815_v8 = vsel %vm812_vm7, %v809_v62, %v811_v4 }
  0xe7   : > { %975 = vmatpush1.msra.mxu0 %v813_v7  ;;  %1046 = vmatpush1.msra.mxu1 %v815_v8 }
  0xe8   : > { %991 = vmatmul.mubr.f32.vlgmr.msra.gmra.mrb[0].mxu0 %v822_v6  ;;  %1062 = vmatmul.mubr.f32.vlgmr.msra.gmra.mrb[0].mxu1 %v822_v6 }
  0xf6   : > { %v924_v9 = vpop.permute.xlu0 %923 }
 0x1bb   : > { %v992_v10 = vpop.f32.mrb[0].mxu0  ;;  %v1063_v11 = vpop.f32.mrb[0].mxu1 }
 0x1bc   : > { %v993_v12 = vadd.f32 %v992_v10, %v924_v9  ;;  %v1064_v13 = vadd.f32 %v1063_v11, %v924_v9  ;;  %v994_v14 = vpop.f32.mrb[1].mxu0  ;;  %v1065_v15 = vpop.f32.mrb[1].mxu1 }
 0x1bd   : > { %v995_v16 = vadd.f32 %v994_v14, %v924_v9 }
 0x1be   : > { %1067 = vst [vmem:[%s170_s26] sm:$0xff] %v993_v12  ;;  %1069 = vst [vmem:[%s170_s26 + $0x10] sm:$0xff] %v1064_v13 }
 0x1bf   : > { %1068 = vst [vmem:[%s170_s26 + $0x8] sm:$0xff] %v995_v16 }
 0x1c0 PF: > { %s13_s12 = sadd.s32 1, %s1493_s12  }
 0x1c1   : > { %p10_p4 = scmp.ge.s32.totalorder %s13_s12, 4  }
 0x1c3   :  { %12 = sbr.rel (!%p10_p4) target bundleno = 1 (0x1), region = 62 }

</bundles_post_ra>
